<compile_context>
chip_gen: v5e
topology: v5e:2x2
jax: 0.10.0
libtpu: 0.0.40
codegen_flags: <defaults>
</compile_context>

<pallas_src>
import jax
import jax.numpy as jnp
from jax.experimental import pallas as pl
from jax.experimental.pallas import tpu as pltpu


def _nsp_kernel(x_ref, w_ref, b_ref, o_ref):
    # x_ref: [TB, Hp] CLS rows (plus zero-weighted padding columns when Hp > H)
    # w_ref: [Hp, 2], b_ref: [1, 2], o_ref: [TB, 2] (float32)
    logits = jnp.dot(x_ref[...], w_ref[...],
                     preferred_element_type=jnp.float32) + b_ref[...].astype(jnp.float32)
    # numerically-stable log_softmax over the (2-wide) last dim
    m = jnp.max(logits, axis=-1, keepdims=True)
    z = logits - m
    lse = jnp.log(jnp.sum(jnp.exp(z), axis=-1, keepdims=True))
    o_ref[...] = (z - lse).astype(o_ref.dtype)


def next_sentence_prediction(x, w, b, *, block_b=512):
    """x: [B, S, H]; w: [H, 2] (transposed nn.Linear weight); b: [2] -> float32 log-probs [B, 2]."""
    B, S, H = x.shape
    assert w.shape == (H, 2) and b.shape == (2,)

    # Metadata-only reshape (contiguous dim-merge == bitcast, no HBM traffic).  The CLS token of
    # batch row i is columns [0, H) of row i in the merged view.
    x2 = x.reshape(B, S * H)

    # Lane-align the column block: last block dim must be a multiple of 128 or the full dim.
    if H % 128 == 0:
        Hp = H
        w_p = w
    else:
        Hp = min(((H + 127) // 128) * 128, S * H)
        # Zero-pad the weight so the extra (token-1, ...) columns contribute nothing to the dot.
        w_p = jnp.concatenate([w, jnp.zeros((Hp - H, 2), dtype=w.dtype)], axis=0)
    b2 = b.reshape(1, 2)

    # Batch tile: >= 2 tiles whenever B >= 16 so v7x's two TensorCores both get work;
    # multiple-of-8 sublanes; capped by block_b; single full-batch block for tiny B.
    half = (B + 1) // 2
    tb = min(block_b, ((half + 7) // 8) * 8)
    TB = B if tb >= B else tb
    grid = (pl.cdiv(B, TB),)

    # v5e's default scoped VMEM is 16 MiB; only ask for more when the tile actually needs it.
    compiler_kwargs = dict(dimension_semantics=("parallel",))
    in_bytes = 2 * TB * Hp * x.dtype.itemsize          # double-buffered CLS tile
    if in_bytes > 12 * 1024 * 1024:
        compiler_kwargs["vmem_limit_bytes"] = min(2 * in_bytes, 48 * 1024 * 1024)

    return pl.pallas_call(
        _nsp_kernel,
        out_shape=jax.ShapeDtypeStruct((B, 2), jnp.float32),
        grid=grid,
        in_specs=[
            pl.BlockSpec((TB, Hp), lambda i: (i, 0)),   # CLS rows: strided DMA straight from x
            pl.BlockSpec((Hp, 2), lambda i: (0, 0)),    # weight: VMEM-resident across grid steps
            pl.BlockSpec((1, 2), lambda i: (0, 0)),     # bias:   VMEM-resident across grid steps
        ],
        out_specs=pl.BlockSpec((TB, 2), lambda i: (i, 0)),
        compiler_params=pltpu.CompilerParams(**compiler_kwargs),
    )(x2, w_p, b2)


if __name__ == "__main__":
    key = jax.random.PRNGKey(0)

    def ref_nsp(x, w, b):
        return jax.nn.log_softmax(
            x[:, 0].astype(jnp.float32) @ w.astype(jnp.float32) + b.astype(jnp.float32),
            axis=-1)

    # 1) lane-aligned hidden (BERT-like path, H % 128 == 0), tiny batch -> single tile.
    B, S, H = 2, 8, 128
    k1, k2, k3, key = jax.random.split(key, 4)
    x = jax.random.normal(k1, (B, S, H), dtype=jnp.float32)
    w = jax.random.normal(k2, (H, 2), dtype=jnp.float32) / jnp.sqrt(H)
    b = jax.random.normal(k3, (2,), dtype=jnp.float32) * 0.01
    out = next_sentence_prediction(x, w, b)
    jax.block_until_ready(out)
    assert out.shape == (B, 2) and out.dtype == jnp.float32
    assert jnp.allclose(out, ref_nsp(x, w, b), atol=1e-5, rtol=1e-5)

    # 2) unaligned hidden (H=32 -> padded column block) + multi-tile batch with a partial tail.
    B, S, H = 20, 6, 32
    k1, k2, k3, key = jax.random.split(key, 4)
    x = jax.random.normal(k1, (B, S, H), dtype=jnp.float32)
    w = jax.random.normal(k2, (H, 2), dtype=jnp.float32) / jnp.sqrt(H)
    b = jax.random.normal(k3, (2,), dtype=jnp.float32) * 0.01
    out = next_sentence_prediction(x, w, b)
    jax.block_until_ready(out)
    assert jnp.allclose(out, ref_nsp(x, w, b), atol=1e-5, rtol=1e-5)

    # 3) bf16 activations/weights pass straight through (f32 accumulation inside the kernel).
    out_bf16 = next_sentence_prediction(x.astype(jnp.bfloat16), w.astype(jnp.bfloat16), b)
    jax.block_until_ready(out_bf16)
    ref_bf16 = ref_nsp(x.astype(jnp.bfloat16), w.astype(jnp.bfloat16), b)
    assert jnp.allclose(out_bf16, ref_bf16, atol=2e-3, rtol=2e-3)

    print("KERNEL_OK")
</pallas_src>

<mosaic_0001>
module attributes {stable_mosaic.version = 11 : i64} {
  func.func @_nsp_kernel(%arg0: i32, %arg1: memref<2x128xf32, #tpu.memory_space<vmem>>, %arg2: memref<128x2xf32, #tpu.memory_space<vmem>>, %arg3: memref<1x2xf32, #tpu.memory_space<vmem>>, %arg4: memref<2x2xf32, #tpu.memory_space<vmem>>) attributes {dimension_semantics = [#tpu.dimension_semantics<parallel>], iteration_bounds = array<i64: 1>, scalar_prefetch = 0 : i64, scratch_operands = 0 : i64, tpu.core_type = #tpu.core_type<tc>, window_params = [{transform_indices = @transform_0, window_bounds = array<i64: 2, 128>}, {pipeline_mode = #tpu.pipeline_mode<synchronous>, transform_indices = @transform_1, window_bounds = array<i64: 128, 2>}, {pipeline_mode = #tpu.pipeline_mode<synchronous>, transform_indices = @transform_2, window_bounds = array<i64: 1, 2>}, {transform_indices = @transform_3, window_bounds = array<i64: 2, 2>}]} {
    %c0 = arith.constant 0 : index
    %c0_0 = arith.constant 0 : index
    %0 = vector.load %arg1[%c0, %c0_0] : memref<2x128xf32, #tpu.memory_space<vmem>>, vector<2x128xf32>
    %c0_1 = arith.constant 0 : index
    %c0_2 = arith.constant 0 : index
    %1 = vector.load %arg2[%c0_1, %c0_2] : memref<128x2xf32, #tpu.memory_space<vmem>>, vector<128x2xf32>
    %cst = arith.constant dense<0.000000e+00> : vector<2x2xf32>
    %2 = tpu.matmul %0, %1, %cst {dimension_numbers = #tpu.dot_dimension_numbers<[1], [0], [0], [1], [0, 0, 1, 1], [], []>} : vector<2x128xf32>, vector<128x2xf32>, vector<2x2xf32> -> vector<2x2xf32>
    %c0_3 = arith.constant 0 : index
    %c0_4 = arith.constant 0 : index
    %3 = vector.load %arg3[%c0_3, %c0_4] : memref<1x2xf32, #tpu.memory_space<vmem>>, vector<1x2xf32>
    %4 = vector.broadcast %3 : vector<1x2xf32> to vector<2x2xf32>
    %5 = arith.addf %2, %4 : vector<2x2xf32>
    %cst_5 = arith.constant dense<0xFF800000> : vector<2xf32>
    %6 = vector.multi_reduction <maximumf>, %5, %cst_5 [1] : vector<2x2xf32> to vector<2xf32>
    %7 = vector.shape_cast %6 : vector<2xf32> to vector<2x1xf32>
    %8 = vector.broadcast %7 : vector<2x1xf32> to vector<2x2xf32>
    %9 = arith.subf %5, %8 : vector<2x2xf32>
    %10 = math.exp %9 : vector<2x2xf32>
    %cst_6 = arith.constant dense<0.000000e+00> : vector<2xf32>
    %11 = vector.multi_reduction <add>, %10, %cst_6 [1] : vector<2x2xf32> to vector<2xf32>
    %12 = vector.shape_cast %11 : vector<2xf32> to vector<2x1xf32>
    %13 = math.log %12 : vector<2x1xf32>
    %14 = vector.broadcast %13 : vector<2x1xf32> to vector<2x2xf32>
    %15 = arith.subf %9, %14 : vector<2x2xf32>
    %c0_7 = arith.constant 0 : index
    %c0_8 = arith.constant 0 : index
    %16 = vector.load %arg4[%c0_7, %c0_8] : memref<2x2xf32, #tpu.memory_space<vmem>>, vector<2x2xf32>
    tpu.vector_store %arg4[%c0_7, %c0_8], %15 {strides = array<i32>} : memref<2x2xf32, #tpu.memory_space<vmem>>, vector<2x2xf32>,
    return
  }
  func.func @transform_0(%arg0: i32) -> (i32, i32) {
    %c0_i32 = arith.constant 0 : i32
    %c0_i32_0 = arith.constant 0 : i32
    return %arg0, %c0_i32 : i32, i32
  }
  func.func @transform_1(%arg0: i32) -> (i32, i32) {
    %c0_i32 = arith.constant 0 : i32
    %c0_i32_0 = arith.constant 0 : i32
    %c0_i32_1 = arith.constant 0 : i32
    return %c0_i32, %c0_i32_0 : i32, i32
  }
  func.func @transform_2(%arg0: i32) -> (i32, i32) {
    %c0_i32 = arith.constant 0 : i32
    %c0_i32_0 = arith.constant 0 : i32
    %c0_i32_1 = arith.constant 0 : i32
    return %c0_i32, %c0_i32_0 : i32, i32
  }
  func.func @transform_3(%arg0: i32) -> (i32, i32) {
    %c0_i32 = arith.constant 0 : i32
    %c0_i32_0 = arith.constant 0 : i32
    return %arg0, %c0_i32 : i32, i32
  }
}

</mosaic_0001>

<bundles_post_ra>
// kernel: tpu_custom_call.1
= control target key start
LH: loop header
LB: loop body
LE: loop exit
PB: predicated region body
PF: predicated region fallthrough
CT: control target
= control target key end

     0   :  { %s199_s0 = inlined_call_operand.vmem [shape: f32[2,1024], index: 0, kind: input, shape index: {}]   ;;  %s200_s1 = inlined_call_operand.vmem [shape: f32[128,2], index: 1, kind: input, shape index: {}]   ;;  %s201_s2 = inlined_call_operand.vmem [shape: f32[1,2], index: 2, kind: input, shape index: {}]   ;;  %s202_s3 = inlined_call_operand.hbm [shape: f32[2,2], index: 3, kind: output, shape index: {}]  }
   0x1   :  { %v31_v0 = vld [vmem:[%s200_s1 + $0x78] sm:$0xff]  ;;  %v30_v1 = vld [vmem:[%s200_s1 + $0x70] sm:$0xff]  ;;  %v29_v2 = vld [vmem:[%s200_s1 + $0x68] sm:$0xff] }
   0x2   :  { %36 = vmatpush.msra.mxu0 %v31_v0  ;;  %v28_v3 = vld [vmem:[%s200_s1 + $0x60] sm:$0xff]  ;;  %v27_v4 = vld [vmem:[%s200_s1 + $0x58] sm:$0xff] }
   0x4   :  { %37 = vmatpush.msra.mxu0 %v30_v1 }
   0x6   :  { %38 = vmatpush.msra.mxu0 %v29_v2 }
   0x7   :  { %8 = vsyncpa [#allocation3], 0  ;;  %v26_v5 = vld [vmem:[%s200_s1 + $0x50] sm:$0xff]  ;;  %v25_v6 = vld [vmem:[%s200_s1 + $0x48] sm:$0xff]  ;;  %vm56_vm0 = vcmask 9216   ;;  %s77_s22 = sshll.u32 %s202_s3, 4  ;;  %s78_s22 = int_to_ptr.hbm [resolvable:$true] %s77_s22 }
   0x8   :  { %39 = vmatpush.msra.mxu0 %v28_v3  ;;  %v24_v7 = vld [vmem:[%s200_s1 + $0x40] sm:$0xff]  ;;  %v23_v8 = vld [vmem:[%s200_s1 + $0x38] sm:$0xff]  ;;  %v22_v9 = vld [vmem:[%s200_s1 + $0x30] sm:$0xff] }
   0x9   :  { %v21_v10 = vld [vmem:[%s200_s1 + $0x28] sm:$0xff]  ;;  %v20_v11 = vld [vmem:[%s200_s1 + $0x20] sm:$0xff]  ;;  %v19_v12 = vld [vmem:[%s200_s1 + $0x18] sm:$0xff] }
   0xa   :  { %40 = vmatpush.msra.mxu0 %v27_v4  ;;  %v18_v13 = vld [vmem:[%s200_s1 + $0x10] sm:$0xff]  ;;  %v17_v14 = vld [vmem:[%s200_s1 + $0x8] sm:$0xff]  ;;  %v16_v15 = vld [vmem:[%s200_s1] sm:$0xff] }
   0xb   :  { %v15_v16 = vld [vmem:[%s199_s0] sm:$0x3]  ;;  %s118_s0 = smov [#allocation2]  }
   0xc   :  { %41 = vmatpush.msra.mxu0 %v26_v5  ;;  %v87_v17 = vld [vmem:[%s201_s2] ss:$0 sm:$0xff]  ;;  %s75_s1 = sshll.u32 %s118_s0, 4  ;;  %s76_s1 = int_to_ptr.vmem [resolvable:$true] %s75_s1 }
   0xe   :  { %42 = vmatpush.msra.mxu0 %v25_v6 }
  0x10   :  { %43 = vmatpush.msra.mxu0 %v24_v7 }
  0x12   :  { %44 = vmatpush.msra.mxu0 %v23_v8 }
  0x14   :  { %45 = vmatpush.msra.mxu0 %v22_v9 }
  0x16   :  { %46 = vmatpush.msra.mxu0 %v21_v10 }
  0x18   :  { %47 = vmatpush.msra.mxu0 %v20_v11 }
  0x1a   :  { %48 = vmatpush.msra.mxu0 %v19_v12 }
  0x1c   :  { %49 = vmatpush.msra.mxu0 %v18_v13 }
  0x1e   :  { %50 = vmatpush.msra.mxu0 %v17_v14 }
  0x20   :  { %51 = vmatpush.msra.mxu0 %v16_v15 }
  0x21   :  { %52 = vmatmul.f32.vlgmr.msra.gmra.mxu0 %v15_v16 }
  0x9e   :  { %v53_v18 = vpop.f32.mrf.mxu0 }
  0x9f   :  { %v54_v19 = vadd.f32 %v87_v17, %v53_v18 }
  0xa1   :  { %v57_v20 = vsel %vm56_vm0, %v54_v19, -inf }
  0xa2   :  { %58 = vmax.xlane.f32.xlu0 %v57_v20 }
 0x115   :  { %v59_v21 = vpop.xlane.xlu0 %58 }
 0x116   :  { %v60_v22 = vsub.f32 %v54_v19, %v59_v21 }
 0x118   :  { %v61_v23 = vmul.f32 1.442695, %v60_v22 }
 0x11a   :  { %88 = vpow2.f32 %v61_v23 }
 0x120   :  { %v89_v24 = vpop.eup %88 }
 0x121   :  { %v63_v25 = vsel %vm56_vm0, %v89_v24, 0.0 }
 0x122   :  { %64 = vadd.xlane.f32.xlu0 %v63_v25 }
 0x195   :  { %v65_v26 = vpop.xlane.xlu0 %64 }
 0x196   :  { %90 = vlog2.f32 %v65_v26 }
 0x19c   :  { %v91_v27 = vpop.eup %90 }
 0x19d   :  { %v67_v28 = vmul.f32 0.6931472, %v91_v27 }
 0x19f   :  { %v68_v29 = vsub.f32 %v60_v22, %v67_v28 }
 0x1a1   :  { %69 = vst.msk [vmem:[#allocation2] sm:$0x3] %vm56_vm0, %v68_v29 }
 0x1a2   :  { %80 = dma.vmem_to_hbm [thread:$0]  %s76_s1, 32, %s78_s22, [#allocation3]  }
 0x1a3   :  { %116 = dma.done.wait [#allocation3], 32  }
 0x1a4   :  { %117 = vsyncadd [#allocation3], 4294967264 }
 0x1a5   :  { %85 = vsyncpa [#allocation3], 1 }

</bundles_post_ra>
